<compile_context>
chip_gen: v7x
topology: tpu7x:2x2x1
jax: 0.10.0
libtpu: 0.0.40
codegen_flags: <defaults>
</compile_context>

<pallas_src>
import functools

import numpy as np

import jax
import jax.numpy as jnp
from jax.experimental import pallas as pl
from jax.experimental.pallas import tpu as pltpu


def _focal_kernel(preds_ref, labels_ref, out_ref, acc_ref, *, alpha, gamma):
    j = pl.program_id(1)

    @pl.when(j == 0)
    def _init():
        acc_ref[...] = jnp.zeros_like(acc_ref)

    num_classes = preds_ref.shape[0]
    lab = labels_ref[...]                                   # (TS, 128) int32

    # Per-class dense (TS, 128) slabs; unrolled over the small static C.
    xs = [preds_ref[ci].astype(jnp.float32) for ci in range(num_classes)]

    m = xs[0]
    for ci in range(1, num_classes):
        m = jnp.maximum(m, xs[ci])                          # (TS, 128)

    sumexp = None
    z_lab = jnp.zeros_like(m)
    e_lab = jnp.zeros_like(m)
    a_lab = jnp.zeros_like(m)   # stays 0 for sentinel-padded rows -> zero loss
    for ci in range(num_classes):
        z = xs[ci] - m
        e = jnp.exp(z)
        sumexp = e if sumexp is None else sumexp + e
        sel = lab == ci
        z_lab = jnp.where(sel, z, z_lab)
        e_lab = jnp.where(sel, e, e_lab)
        a_lab = jnp.where(sel, jnp.float32(alpha[ci]), a_lab)

    # p = exp(z_label) / sum(exp(z)): reuse exp(z) with an EUP approx
    # reciprocal; one Newton step on the VPU restores ~f32 accuracy.
    r = pl.reciprocal(sumexp, approx=True)
    r = r * (2.0 - sumexp * r)
    p = e_lab * r
    logp = z_lab - jnp.log(sumexp)

    # (1 - p)^gamma, specialized to VPU multiplies for integer gamma.
    one_minus_p = 1.0 - p
    g = float(gamma)
    if g.is_integer() and 0 <= g <= 16:
        gi = int(g)
        if gi == 0:
            w = jnp.ones_like(one_minus_p)
        else:
            w = one_minus_p
            for _ in range(gi - 1):
                w = w * one_minus_p
    else:
        w = jnp.power(one_minus_p, jnp.float32(g))

    acc_ref[...] += (-a_lab) * w * logp                     # dense (TS,128) acc

    # Single cross-lane reduction per core slot; lane-dense output block.
    @pl.when(j == pl.num_programs(1) - 1)
    def _finish():
        total = jnp.sum(acc_ref[...])
        out_ref[...] = jnp.zeros(out_ref.shape, jnp.float32) + total


def focal_loss_pallas(preds, labels, alpha, *, gamma=2.0, size_average=True,
                      num_cores=2, ts=512):
    """preds: [..., C] float (any dtype), labels: [...] int. Scalar f32 loss.

    `alpha` must be a static per-class weight vector of length C (like the
    module's self.alpha after __init__).  On v5e use num_cores=1.
    """
    C = preds.shape[-1]
    alpha_t = tuple(float(a) for a in np.asarray(alpha, dtype=np.float32).reshape(-1))
    assert len(alpha_t) == C

    preds2 = preds.reshape(-1, C)                   # keep native dtype (bf16 ok)
    labels1 = labels.reshape(-1).astype(jnp.int32)
    M = preds2.shape[0]
    lanes = 128

    # Rows per grid step = ts * 128; shrink ts for tiny inputs to avoid silly
    # padding (always a multiple of 16 so bf16 (16,128) tiling is satisfied).
    if M < num_cores * ts * lanes:
        ts = max(16, ((-(-M // (num_cores * lanes)) + 15) // 16) * 16)
    chunk = num_cores * ts * lanes
    M_pad = -(-M // chunk) * chunk
    NB = M_pad // chunk                              # blocks per core slot
    nblk = M_pad // lanes                            # total 128-row groups

    # Lane-dense layout: classes on the leading axis, 128 rows per lane group.
    # TODO(synk): in production, have the producer emit this (C, ., 128) layout
    # (or fuse the transpose upstream) so this extra HBM pass disappears.
    preds_p = jnp.pad(preds2, ((0, M_pad - M), (0, 0)))
    preds_t = preds_p.T.reshape(C, nblk, lanes)
    # Sentinel label == C on padded rows -> alpha term (and loss) is exactly 0,
    # so no per-step validity mask is needed in the kernel.
    labels_r = jnp.pad(labels1, (0, M_pad - M),
                       constant_values=C).reshape(nblk, lanes)

    kernel = functools.partial(_focal_kernel, alpha=alpha_t, gamma=float(gamma))
    pbytes = jnp.dtype(preds_t.dtype).itemsize

    out = pl.pallas_call(
        kernel,
        out_shape=jax.ShapeDtypeStruct((num_cores * 8, 128), jnp.float32),
        grid_spec=pltpu.PrefetchScalarGridSpec(
            num_scalar_prefetch=0,
            grid=(num_cores, NB),
            in_specs=[
                pl.BlockSpec((C, ts, lanes), lambda c, j: (0, c * NB + j, 0)),
                pl.BlockSpec((ts, lanes), lambda c, j: (c * NB + j, 0)),
            ],
            out_specs=pl.BlockSpec((8, 128), lambda c, j: (c, 0)),
            scratch_shapes=[pltpu.VMEM((ts, lanes), jnp.float32)],
        ),
        compiler_params=pltpu.CompilerParams(
            dimension_semantics=("parallel", "arbitrary")),
        cost_estimate=pl.CostEstimate(
            flops=20 * M_pad * C,
            transcendentals=M_pad * (C + 1),
            bytes_accessed=M_pad * (C * pbytes + 4) + num_cores * 8 * 128 * 4,
        ),
    )(preds_t, labels_r)

    partials = out.reshape(num_cores, 8, 128)[:, 0, 0]   # one partial per slot
    total = jnp.sum(partials)
    if size_average:
        return total / jnp.float32(M)
    return total


def build_alpha(alpha, num_classes):
    """Mirror focal_loss.__init__ handling of alpha (static, host-side)."""
    if alpha is None:
        return np.ones((num_classes,), np.float32)
    if isinstance(alpha, (list, tuple)):
        assert len(alpha) == num_classes
        return np.asarray(alpha, np.float32)
    assert alpha < 1
    out = np.full((num_classes,), 1.0 - float(alpha), np.float32)
    out[0] = float(alpha)
    return out


def focal_loss_ref(preds, labels, alpha, *, gamma=2.0, size_average=True):
    """Pure-JAX reference matching the PyTorch module semantics."""
    C = preds.shape[-1]
    preds2 = preds.reshape(-1, C).astype(jnp.float32)
    labels1 = labels.reshape(-1).astype(jnp.int32)
    logsoft = jax.nn.log_softmax(preds2, axis=1)
    logp = jnp.take_along_axis(logsoft, labels1[:, None], axis=1)[:, 0]
    p = jnp.exp(logp)
    a = jnp.asarray(alpha, jnp.float32)[labels1]
    loss = -a * jnp.power(1.0 - p, gamma) * logp
    return jnp.mean(loss) if size_average else jnp.sum(loss)


if __name__ == "__main__":
    key = jax.random.PRNGKey(0)
    k1, k2 = jax.random.split(key)

    # Detection-style inputs: B batches, N boxes, C classes (num_classes=3).
    B, N, C = 2, 8, 3
    preds = jax.random.normal(k1, (B, N, C), dtype=jnp.float32)
    labels = jax.random.randint(k2, (B, N), 0, C, dtype=jnp.int32)

    # Default __init__: alpha = ones(num_classes), gamma = 2, size_average.
    alpha = build_alpha(None, C)

    out = focal_loss_pallas(preds, labels, alpha, gamma=2.0, size_average=True)
    out = jax.block_until_ready(out)

    ref = focal_loss_ref(preds, labels, jnp.asarray(alpha), gamma=2.0,
                         size_average=True)
    assert jnp.allclose(out, ref, rtol=1e-4, atol=1e-5), (out, ref)

    print("KERNEL_OK")
</pallas_src>

<mosaic_0001>
module attributes {stable_mosaic.version = 11 : i64} {
  func.func @_focal_kernel(%arg0: i32, %arg1: i32, %arg2: memref<3x16x128xf32, #tpu.memory_space<vmem>>, %arg3: memref<16x128xi32, #tpu.memory_space<vmem>>, %arg4: memref<8x128xf32, #tpu.memory_space<vmem>>, %arg5: memref<16x128xf32, #tpu.memory_space<vmem>>) attributes {dimension_semantics = [#tpu.dimension_semantics<parallel>, #tpu.dimension_semantics<arbitrary>], iteration_bounds = array<i64: 2, 1>, scalar_prefetch = 0 : i64, scratch_operands = 1 : i64, tpu.core_type = #tpu.core_type<tc>, window_params = [{transform_indices = @transform_0, window_bounds = array<i64: 3, 16, 128>}, {transform_indices = @transform_1, window_bounds = array<i64: 16, 128>}, {transform_indices = @transform_2, window_bounds = array<i64: 8, 128>}]} {
    %c0_i32 = arith.constant 0 : i32
    %0 = arith.cmpi eq, %arg1, %c0_i32 : i32
    %1 = arith.extui %0 : i1 to i32
    %c0_i32_0 = arith.constant 0 : i32
    %2 = arith.cmpi ne, %1, %c0_i32_0 : i32
    scf.if %2 {
      %cst_24 = arith.constant 0.000000e+00 : f32
      %62 = vector.broadcast %cst_24 : f32 to vector<16x128xf32>
      %c0_25 = arith.constant 0 : index
      %c0_26 = arith.constant 0 : index
      %63 = vector.load %arg5[%c0_25, %c0_26] : memref<16x128xf32, #tpu.memory_space<vmem>>, vector<16x128xf32>
      tpu.vector_store %arg5[%c0_25, %c0_26], %62 {strides = array<i32>} : memref<16x128xf32, #tpu.memory_space<vmem>>, vector<16x128xf32>,
    } else {
    }
    %c0 = arith.constant 0 : index
    %c0_1 = arith.constant 0 : index
    %3 = vector.load %arg3[%c0, %c0_1] : memref<16x128xi32, #tpu.memory_space<vmem>>, vector<16x128xi32>
    %c0_2 = arith.constant 0 : index
    %c0_3 = arith.constant 0 : index
    %c0_4 = arith.constant 0 : index
    %4 = vector.load %arg2[%c0_2, %c0_3, %c0_4] : memref<3x16x128xf32, #tpu.memory_space<vmem>>, vector<1x16x128xf32>
    %5 = vector.shape_cast %4 : vector<1x16x128xf32> to vector<16x128xf32>
    %c1 = arith.constant 1 : index
    %c0_5 = arith.constant 0 : index
    %c0_6 = arith.constant 0 : index
    %6 = vector.load %arg2[%c1, %c0_5, %c0_6] : memref<3x16x128xf32, #tpu.memory_space<vmem>>, vector<1x16x128xf32>
    %7 = vector.shape_cast %6 : vector<1x16x128xf32> to vector<16x128xf32>
    %c2 = arith.constant 2 : index
    %c0_7 = arith.constant 0 : index
    %c0_8 = arith.constant 0 : index
    %8 = vector.load %arg2[%c2, %c0_7, %c0_8] : memref<3x16x128xf32, #tpu.memory_space<vmem>>, vector<1x16x128xf32>
    %9 = vector.shape_cast %8 : vector<1x16x128xf32> to vector<16x128xf32>
    %10 = arith.maximumf %5, %7 : vector<16x128xf32>
    %11 = arith.maximumf %10, %9 : vector<16x128xf32>
    %cst = arith.constant 0.000000e+00 : f32
    %12 = vector.broadcast %cst : f32 to vector<16x128xf32>
    %cst_9 = arith.constant 0.000000e+00 : f32
    %13 = vector.broadcast %cst_9 : f32 to vector<16x128xf32>
    %cst_10 = arith.constant 0.000000e+00 : f32
    %14 = vector.broadcast %cst_10 : f32 to vector<16x128xf32>
    %15 = arith.subf %5, %11 : vector<16x128xf32>
    %16 = math.exp %15 : vector<16x128xf32>
    %c0_i32_11 = arith.constant 0 : i32
    %17 = vector.broadcast %c0_i32_11 : i32 to vector<16x128xi32>
    %18 = arith.cmpi eq, %3, %17 : vector<16x128xi32>
    %19 = arith.select %18, %15, %12 : vector<16x128xi1>, vector<16x128xf32>
    %20 = arith.select %18, %16, %13 : vector<16x128xi1>, vector<16x128xf32>
    %cst_12 = arith.constant 1.000000e+00 : f32
    %21 = vector.broadcast %cst_12 : f32 to vector<16x128xf32>
    %22 = arith.select %18, %21, %14 : vector<16x128xi1>, vector<16x128xf32>
    %23 = arith.subf %7, %11 : vector<16x128xf32>
    %24 = math.exp %23 : vector<16x128xf32>
    %25 = arith.addf %16, %24 : vector<16x128xf32>
    %c1_i32 = arith.constant 1 : i32
    %26 = vector.broadcast %c1_i32 : i32 to vector<16x128xi32>
    %27 = arith.cmpi eq, %3, %26 : vector<16x128xi32>
    %28 = arith.select %27, %23, %19 : vector<16x128xi1>, vector<16x128xf32>
    %29 = arith.select %27, %24, %20 : vector<16x128xi1>, vector<16x128xf32>
    %cst_13 = arith.constant 1.000000e+00 : f32
    %30 = vector.broadcast %cst_13 : f32 to vector<16x128xf32>
    %31 = arith.select %27, %30, %22 : vector<16x128xi1>, vector<16x128xf32>
    %32 = arith.subf %9, %11 : vector<16x128xf32>
    %33 = math.exp %32 : vector<16x128xf32>
    %34 = arith.addf %25, %33 : vector<16x128xf32>
    %c2_i32 = arith.constant 2 : i32
    %35 = vector.broadcast %c2_i32 : i32 to vector<16x128xi32>
    %36 = arith.cmpi eq, %3, %35 : vector<16x128xi32>
    %37 = arith.select %36, %32, %28 : vector<16x128xi1>, vector<16x128xf32>
    %38 = arith.select %36, %33, %29 : vector<16x128xi1>, vector<16x128xf32>
    %cst_14 = arith.constant 1.000000e+00 : f32
    %39 = vector.broadcast %cst_14 : f32 to vector<16x128xf32>
    %40 = arith.select %36, %39, %31 : vector<16x128xi1>, vector<16x128xf32>
    %41 = tpu.reciprocal %34 {approx = true} : vector<16x128xf32> -> vector<16x128xf32>
    %42 = arith.mulf %34, %41 : vector<16x128xf32>
    %cst_15 = arith.constant 2.000000e+00 : f32
    %43 = vector.broadcast %cst_15 : f32 to vector<16x128xf32>
    %44 = arith.subf %43, %42 : vector<16x128xf32>
    %45 = arith.mulf %41, %44 : vector<16x128xf32>
    %46 = arith.mulf %38, %45 : vector<16x128xf32>
    %47 = math.log %34 : vector<16x128xf32>
    %48 = arith.subf %37, %47 : vector<16x128xf32>
    %cst_16 = arith.constant 1.000000e+00 : f32
    %49 = vector.broadcast %cst_16 : f32 to vector<16x128xf32>
    %50 = arith.subf %49, %46 : vector<16x128xf32>
    %51 = arith.mulf %50, %50 : vector<16x128xf32>
    %c0_17 = arith.constant 0 : index
    %c0_18 = arith.constant 0 : index
    %52 = vector.load %arg5[%c0_17, %c0_18] : memref<16x128xf32, #tpu.memory_space<vmem>>, vector<16x128xf32>
    %cst_19 = arith.constant 0.000000e+00 : f32
    %53 = vector.broadcast %cst_19 : f32 to vector<16x128xf32>
    %54 = arith.subf %53, %40 : vector<16x128xf32>
    %55 = arith.mulf %54, %51 : vector<16x128xf32>
    %56 = arith.mulf %55, %48 : vector<16x128xf32>
    %57 = arith.addf %52, %56 : vector<16x128xf32>
    %c0_20 = arith.constant 0 : index
    %c0_21 = arith.constant 0 : index
    %58 = vector.load %arg5[%c0_20, %c0_21] : memref<16x128xf32, #tpu.memory_space<vmem>>, vector<16x128xf32>
    tpu.vector_store %arg5[%c0_20, %c0_21], %57 {strides = array<i32>} : memref<16x128xf32, #tpu.memory_space<vmem>>, vector<16x128xf32>,
    %c0_i32_22 = arith.constant 0 : i32
    %59 = arith.cmpi eq, %arg1, %c0_i32_22 : i32
    %60 = arith.extui %59 : i1 to i32
    %c0_i32_23 = arith.constant 0 : i32
    %61 = arith.cmpi ne, %60, %c0_i32_23 : i32
    scf.if %61 {
      %c0_24 = arith.constant 0 : index
      %c0_25 = arith.constant 0 : index
      %62 = vector.load %arg5[%c0_24, %c0_25] : memref<16x128xf32, #tpu.memory_space<vmem>>, vector<16x128xf32>
      %63 = vector.shape_cast %62 : vector<16x128xf32> to vector<1x16x128xf32>
      %cst_26 = arith.constant dense<0.000000e+00> : vector<1xf32>
      %64 = vector.multi_reduction <add>, %63, %cst_26 [1, 2] : vector<1x16x128xf32> to vector<1xf32>
      %65 = vector.shape_cast %64 : vector<1xf32> to vector<1x1x1xf32>
      %66 = vector.extract %65[0, 0, 0] : f32 from vector<1x1x1xf32>
      %cst_27 = arith.constant 0.000000e+00 : f32
      %67 = vector.broadcast %cst_27 : f32 to vector<8x128xf32>
      %68 = vector.broadcast %66 : f32 to vector<8x128xf32>
      %69 = arith.addf %67, %68 : vector<8x128xf32>
      %c0_28 = arith.constant 0 : index
      %c0_29 = arith.constant 0 : index
      %70 = vector.load %arg4[%c0_28, %c0_29] : memref<8x128xf32, #tpu.memory_space<vmem>>, vector<8x128xf32>
      tpu.vector_store %arg4[%c0_28, %c0_29], %69 {strides = array<i32>} : memref<8x128xf32, #tpu.memory_space<vmem>>, vector<8x128xf32>,
    } else {
    }
    return
  }
  func.func @transform_0(%arg0: i32, %arg1: i32) -> (i32, i32, i32) {
    %c1_i32 = arith.constant 1 : i32
    %0 = arith.muli %arg0, %c1_i32 : i32
    %1 = arith.addi %0, %arg1 : i32
    %c0_i32 = arith.constant 0 : i32
    %c0_i32_0 = arith.constant 0 : i32
    %c0_i32_1 = arith.constant 0 : i32
    return %c0_i32, %1, %c0_i32_0 : i32, i32, i32
  }
  func.func @transform_1(%arg0: i32, %arg1: i32) -> (i32, i32) {
    %c1_i32 = arith.constant 1 : i32
    %0 = arith.muli %arg0, %c1_i32 : i32
    %1 = arith.addi %0, %arg1 : i32
    %c0_i32 = arith.constant 0 : i32
    %c0_i32_0 = arith.constant 0 : i32
    return %1, %c0_i32 : i32, i32
  }
  func.func @transform_2(%arg0: i32, %arg1: i32) -> (i32, i32) {
    %c0_i32 = arith.constant 0 : i32
    %c0_i32_0 = arith.constant 0 : i32
    return %arg0, %c0_i32 : i32, i32
  }
}

</mosaic_0001>

<bundles_post_ra>
// kernel: tpu_custom_call.1
= control target key start
LH: loop header
LB: loop body
LE: loop exit
PB: predicated region body
PF: predicated region fallthrough
CT: control target
= control target key end

     0   :  { %7 = vsyncpa [#allocation4], 0  ;;  %s967_s0 = inlined_call_operand.hbm [shape: f32[3,32,128], index: 0, kind: input, shape index: {}]   ;;  %s968_s1 = inlined_call_operand.hbm [shape: s32[32,128], index: 1, kind: input, shape index: {}]   ;;  %s969_s2 = inlined_call_operand.hbm [shape: f32[16,128], index: 2, kind: output, shape index: {}]  }
   0x1   :  { %9 = vsyncpa [#allocation4 + $0x1], 0 }
   0x2   :  { %10 = vsyncpa [#allocation7], 0 }
   0x3   :  { %12 = vsyncpa [#allocation7 + $0x1], 0 }
   0x4   :  { %13 = vsyncpa [#allocation5], 0 }
   0x5   :  { %15 = vsyncpa [#allocation5 + $0x1], 0  ;;  %s747_s9 = smov 0   ;;  %s749_s10 = smov 0  }
   0x6   :  { %s751_s11 = smov 0   ;;  %s753_s12 = smov 0  }
   0x7   :  { %s755_s13 = smov 0   ;;  %s757_s14 = smov 0  }
   0x8 LB: > { %s482_s15 = sadd.s32 4294967295, %s719_s14   ;;  %s483_s16 = sadd.s32 4294967294, %s719_s14   ;;  %s719_s14 = sphi %s757_s14, %s21_s14   ;;  %s715_s13 = sphi %s755_s13, %s983_s13   ;;  %s711_s12 = sphi %s753_s12, %s982_s12   ;;  %s707_s11 = sphi %s751_s11, %s981_s11   ;;  %s703_s10 = sphi %s749_s10, %s980_s10   ;;  %s699_s9 = sphi %s747_s9, %s979_s9  }
   0x9   : > { %s33_s17 = sadd.s32 1, %s715_s13  ;;  %s42_s18 = sadd.s32 1, %s707_s11 }
   0xa   : > { %p35_p0 = scmp.ge.s32.totalorder %s33_s17, 2  ;;  %p49_p1 = scmp.ne.s32.totalorder %s707_s11, %s703_s10 }
   0xb   : > { %p50_p2 = scmp.eq.s32.totalorder %s719_s14, 0  ;;  %p55_p3 = scmp.ne.s32.totalorder %s703_s10, %s699_s9 }
   0xc   : > { %s985_s17 = smov (%p35_p0, %s33_s17), 0  ;;  %p56_p5 = scmp.eq.s32.totalorder %s482_s15, 0 }
   0xd   : > { %p788_p4 = por %p50_p2, %p49_p1  ;;  %s39_s20 = ssub.s32 %s715_s13, %s985_s17 }
   0xe   : > { %p107_p6 = scmp.eq.s32.totalorder %s482_s15, 1  ;;  %p40_p7 = scmp.eq.s32.totalorder %s39_s20, 0 }
   0xf   : > { %p794_p8 = por %p56_p5, %p55_p3  ;;  %p113_p10 = scmp.eq.s32.totalorder %s483_s16, 1 }
  0x10   : > { %p798_p9 = por %p107_p6, %p49_p1  ;;  %p970_p12 = scmp.ge.s32.totalorder %s719_s14, 2 }
  0x11   : > { %s803_s23 = scalar_select %p40_p7, %s707_s11, %s42_s18  }
  0x12   : > { %s974_s22 = scalar_select %p798_p9, 1, 0 }
  0x13   : > { %p805_p11 = por %p113_p10, %p55_p3  ;;  %129 = sbr.rel (%p970_p12) target bundleno = 64 (0x40), region = 16 }
  0x15   : > { %s975_s24 = scalar_select %p805_p11, 1, 0 }
  0x1a   : > { %s813_s25 = sand.u32 1, %s707_s11   ;;  %s504_s27 = sshll.u32 %s715_s13, 8 }
  0x1b   : > { %s506_s26 = smul.u32 48, %s813_s25  ;;  %s721_s28 = smov 512  }
  0x1c   : > { %511 = sst [smem:[#allocation10]] (%p788_p4), %s721_s28  ;;  %s144_s4 = scalar_lea.hbm %s967_s0, %s504_s27 }
  0x1d   : > { %s510_s29 = scalar_select %p788_p4, [#allocation0], [#allocation11] }
  0x1e   : > { %s137_s6 = scalar_lea.vmem [#allocation3], %s506_s26  ;;  %s722_s8 = smov 256  }
  0x1f   : > { %s149_s5 = sld [smem:[%s510_s29]]   ;;  %s157_s7 = sshll.u32 %s137_s6, 4  ;;  %s158_s7 = int_to_ptr.vmem [resolvable:$true] %s157_s7 }
  0x20   : > { %512 = sst [smem:[#allocation10 + $0x1]] (%p788_p4), %s722_s8  ;;  %s723_s15 = smov 2  }
  0x21   : > { %513 = sst [smem:[#allocation10 + $0x2]] (%p788_p4), %s723_s15  ;;  %s724_s16 = smov 128  }
  0x22   : > { %514 = sst [smem:[#allocation10 + $0x3]] (%p788_p4), %s724_s16  ;;  %s725_s18 = smov 8  }
  0x23   : > { %515 = sst [smem:[#allocation10 + $0x4]] (%p788_p4), %s724_s16  ;;  %s134_s26 = scalar_lea.sflag [#allocation4], %s813_s25 }
  0x24   : > { %516 = sst [smem:[#allocation10 + $0x5]] (%p788_p4), %s725_s18  ;;  %s726_s29 = smov [#allocation9]  }
  0x25   : > { %s488_s20 = sshll.u32 %s149_s5, 26  ;;  %s490_s30 = sshll.u32 %s813_s25, 4 }
  0x26   : > { %s489_s28 = sadd.s32 134217728, %s488_s20  ;;  %s841_s8 = scalar_lea.hbm %s968_s1, %s504_s27 }
  0x27   : > { %517 = dma.general (%p788_p4), %s144_s4, 768, %s158_s7, %s134_s26, %s726_s29, [#allocation10], %s489_s28, 0  }
  0x28   : > { %s184_s15 = scalar_lea.vmem [#allocation6], %s490_s30  ;;  %s181_s16 = scalar_lea.sflag [#allocation7], %s813_s25 }
  0x29   : > { %s192_s5 = sshll.u32 %s184_s15, 4  ;;  %s605_s18 = scalar_lea.hbm %s841_s8, 256  ;;  %s843_s5 = int_to_ptr.vmem [resolvable:$true] %s192_s5 }
  0x2a   : > { %p606_p13 = scmp.ne.s32.totalorder %s841_s8, %s605_s18  ;;  %s609_s20 = scalar_lea.hbm %s968_s1, 512 }
  0x2b   : > { %p610_p2 = scmp.lt.u32.totalorder %s841_s8, %s968_s1  ;;  %p611_p3 = scmp.lt.u32.totalorder %s609_s20, %s605_s18 }
  0x2c   : > { %p607_p0 = pnand %p606_p13, %p788_p4  ;;  %p613_p6 = scmp.lt.u32.totalorder %s605_s18, %s841_s8 }
  0x2d   : > { %p612_p5 = por %p611_p3, %p610_p2 }
  0x2e   : > { %p608_p1 = pneg %p607_p0 }
  0x2f   : > { %p614_p7 = por %p613_p6, %p612_p5 }
  0x31   : > { %p615_p10 = pnand %p614_p7, %p608_p1 }
  0x33   : > { %618 = shalt.err (!%p615_p10)
}
  0x34   : > { %s619_s26 = scalar_lea.vmem %s843_s5, 256  ;;  %s727_s29 = smov [#allocation6]  }
  0x35   : > { %p620_p13 = scmp.ne.s32.totalorder %s843_s5, %s619_s26  ;;  %s623_s30 = sshll.u32 %s727_s29, 4  ;;  %s624_s30 = int_to_ptr.vmem [resolvable:$false] %s623_s30 }
  0x36   : > { %s625_s3 = scalar_lea.vmem %s624_s30, 512  ;;  %p626_p11 = scmp.lt.s32.totalorder %s843_s5, %s624_s30 }
  0x37   : > { %p621_p0 = pnand %p620_p13, %p788_p4  ;;  %p627_p9 = scmp.lt.s32.totalorder %s625_s3, %s619_s26 }
  0x39   : > { %p622_p12 = pneg %p621_p0  ;;  %p628_p2 = por %p627_p9, %p626_p11 }
  0x3b   : > { %p629_p3 = pnand %p628_p2, %p622_p12 }
  0x3d   : > { %632 = shalt.err (!%p629_p3)
}
  0x3e   : > { %s728_s6 = smov 128   ;;  %s729_s15 = smov 8  }
  0x3f   : > { %518 = dma.hbm_to_vmem [thread:$0]  (%p788_p4), %s841_s8, 256, %s843_s5, %s181_s16, %s728_s6, %s728_s6, %s729_s15  }
  0x40 PF: > { %p493_p1 = scmp.ge.s32.totalorder %s719_s14, 1  ;;  %p200_p5 = scmp.lt.s32.totalorder %s719_s14, 3 }
  0x42   : > { %p201_p6 = pnand %p493_p1, %p200_p5 }
  0x43   : > { %s872_s18 = sand.u32 (!%p201_p6), 1, %s703_s10  }
  0x44   : > { %204 = sbr.rel (%p201_p6) target bundleno = 355 (0x163), region = 28  ;;  %s207_s7 = scalar_lea.sflag (!%p201_p6), [#allocation4], %s872_s18 }
  0x45   : > { %s507_s4 = smul.u32 (!%p201_p6), 48, %s872_s18 }
  0x47   : > { %s210_s20 = scalar_lea.vmem (!%p201_p6), [#allocation3], %s507_s4 }
  0x4b   : > { %686 = dma.done.wait (%p794_p8), %s207_s7, 768  }
  0x4c   : > { %688 = vsyncadd (%p794_p8), %s207_s7, 4294966528  ;;  %s494_s19 = sshll.u32 %s872_s18, 4  ;;  %s216_s25 = scalar_lea.sflag [#allocation7], %s872_s18 }
  0x4d   : > { %s882_s8 = scalar_lea.vmem [#allocation6], %s494_s19 }
  0x4e   : > { %690 = dma.done.wait (%p794_p8), %s216_s25, 256  }
  0x4f   : > { %692 = vsyncadd (%p794_p8), %s216_s25, 4294967040  ;;  %v257_v0 = vld [vmem:[%s210_s20] sm:$0xff]  ;;  %v258_v1 = vld [vmem:[%s210_s20 + $0x8] sm:$0xff]  ;;  %v730_v37 = vmov 0.0   ;;  %s495_s21 = sshll.u32 %s872_s18, 3  ;;  %s501_s27 = sshll.u32 %s711_s12, 7 }
  0x50   : > { %v496_v2 = vld [vmem:[%s210_s20 + $0x10] sm:$0xff]  ;;  %v497_v3 = vld [vmem:[%s210_s20 + $0x18] sm:$0xff]  ;;  %v498_v4 = vld [vmem:[%s210_s20 + $0x20] sm:$0xff]  ;;  %s244_s5 = scalar_lea.vmem [#allocation8], %s495_s21  ;;  %s920_s30 = scalar_lea.hbm %s969_s2, %s501_s27 }
  0x51   : > { %v499_v5 = vld [vmem:[%s210_s20 + $0x28] sm:$0xff]  ;;  %v265_v6 = vmax.f32 %v257_v0, %v496_v2  ;;  %v266_v7 = vmax.f32 %v258_v1, %v497_v3  ;;  %v255_v32 = vld [vmem:[%s882_s8] sm:$0xff]  ;;  %s379_s16 = sshll.u32 %s244_s5, 4  ;;  %s366_s3 = scalar_lea.sflag [#allocation5], %s872_s18  ;;  %s915_s16 = int_to_ptr.vmem [resolvable:$true] %s379_s16 }
  0x52   : > { %v256_v33 = vld [vmem:[%s882_s8 + $0x8] sm:$0xff]  ;;  %vm275_vm0 = vcmp.eq.s32.totalorder %v255_v32, 0  ;;  %vm291_vm2 = vcmp.eq.s32.totalorder %v255_v32, 1  ;;  %vm307_vm4 = vcmp.eq.s32.totalorder %v255_v32, 2  ;;  %s633_s6 = scalar_lea.vmem %s915_s16, 128  ;;  %p976_p8 = scmp.ne.s32.totalorder %s974_s22, 0 }
  0x53   : > { %v267_v8 = vmax.f32 %v265_v6, %v498_v4  ;;  %v268_v9 = vmax.f32 %v266_v7, %v499_v5  ;;  %vm276_vm1 = vcmp.eq.s32.totalorder %v256_v33, 0  ;;  %vm292_vm3 = vcmp.eq.s32.totalorder %v256_v33, 1  ;;  %p634_p4 = scmp.ne.s32.totalorder %s915_s16, %s633_s6  ;;  %s731_s12 = smov [#allocation8]  }
  0x54   : > { %v281_v38 = vsel %vm275_vm0, 1.0, %v730_v37  ;;  %v282_v40 = vsel %vm276_vm1, 1.0, %v730_v37  ;;  %vm308_vm5 = vcmp.eq.s32.totalorder %v256_v33, 2  ;;  %s637_s15 = sshll.u32 %s731_s12, 4  ;;  %s638_s15 = int_to_ptr.vmem [resolvable:$false] %s637_s15 }
  0x55   : > { %v269_v10 = vsub.f32 %v257_v0, %v267_v8  ;;  %v270_v11 = vsub.f32 %v258_v1, %v268_v9  ;;  %v283_v12 = vsub.f32 %v496_v2, %v267_v8  ;;  %v284_v13 = vsub.f32 %v497_v3, %v268_v9  ;;  %p635_p9 = pnand %p634_p4, %p976_p8  ;;  %s639_s4 = scalar_lea.vmem %s638_s15, 256 }
  0x56   : > { %v888_v14 = vsub.f32 %v498_v4, %v267_v8  ;;  %v890_v15 = vsub.f32 %v499_v5, %v268_v9  ;;  %v297_v47 = vsel %vm291_vm2, 1.0, %v281_v38  ;;  %v298_v50 = vsel %vm292_vm3, 1.0, %v282_v40  ;;  %p640_p12 = scmp.lt.s32.totalorder %s915_s16, %s638_s15  ;;  %p641_p7 = scmp.lt.s32.totalorder %s639_s4, %s633_s6 }
  0x57   : > { %v271_v16 = vmul.f32 1.442695, %v269_v10  ;;  %v273_v17 = vmul.f32 1.442695, %v270_v11  ;;  %v285_v18 = vmul.f32 1.442695, %v283_v12  ;;  %p636_p11 = pneg %p635_p9 }
  0x58   : > { %v287_v19 = vmul.f32 1.442695, %v284_v13  ;;  %v301_v20 = vmul.f32 1.442695, %v888_v14  ;;  %v303_v21 = vmul.f32 1.442695, %v890_v15  ;;  %p642_p10 = por %p641_p7, %p640_p12 }
  0x59   : > { %585 = vpow2.f32 %v271_v16  ;;  %v277_v43 = vsel %vm275_vm0, %v269_v10, 0.0  ;;  %v278_v46 = vsel %vm276_vm1, %v270_v11, 0.0  ;;  %v313_v58 = vsel %vm307_vm4, 1.0, %v297_v47 }
  0x5a   : > { %587 = vpow2.f32 %v273_v17  ;;  %v293_v54 = vsel %vm291_vm2, %v283_v12, %v277_v43  ;;  %v294_v57 = vsel %vm292_vm3, %v284_v13, %v278_v46  ;;  %v314_v60 = vsel %vm308_vm5, 1.0, %v298_v50  ;;  %p643_p13 = pnand %p642_p10, %p636_p11 }
  0x5b   : > { %589 = vpow2.f32 %v285_v18  ;;  %v309_v63 = vsel %vm307_vm4, %v888_v14, %v293_v54  ;;  %v310_v2 = vsel %vm308_vm5, %v890_v15, %v294_v57  ;;  %v337_v4 = vsub.f32 0.0, %v313_v58 }
  0x5c   : > { %591 = vpow2.f32 %v287_v19  ;;  %v338_v6 = vsub.f32 0.0, %v314_v60 }
  0x5d   : > { %593 = vpow2.f32 %v301_v20 }
  0x5e   : > { %595 = vpow2.f32 %v303_v21 }
  0x63   : > { %v586_v22 = vpop.eup %585 }
  0x64   : > { %v588_v23 = vpop.eup %587  ;;  %v279_v34 = vsel %vm275_vm0, %v586_v22, 0.0 }
  0x65   : > { %v590_v24 = vpop.eup %589  ;;  %v280_v35 = vsel %vm276_vm1, %v588_v23, 0.0 }
  0x66   : > { %v592_v25 = vpop.eup %591  ;;  %v289_v26 = vadd.f32 %v590_v24, %v586_v22  ;;  %v295_v41 = vsel %vm291_vm2, %v590_v24, %v279_v34 }
  0x67   : > { %v594_v27 = vpop.eup %593  ;;  %v290_v28 = vadd.f32 %v592_v25, %v588_v23  ;;  %v296_v44 = vsel %vm292_vm3, %v592_v25, %v280_v35 }
  0x68   : > { %v596_v29 = vpop.eup %595  ;;  %v305_v30 = vadd.f32 %v594_v27, %v289_v26  ;;  %v311_v51 = vsel %vm307_vm4, %v594_v27, %v295_v41 }
  0x69   : > { %v306_v31 = vadd.f32 %v596_v29, %v290_v28  ;;  %v312_v55 = vsel %vm308_vm5, %v596_v29, %v296_v44 }
  0x6a   : > { %597 = vrcp.f32 %v305_v30 }
  0x6b   : > { %599 = vrcp.f32 %v306_v31 }
  0x6c   : > { %601 = vlog2.f32 %v305_v30 }
  0x6d   : > { %603 = vlog2.f32 %v306_v31 }
  0x74   : > { %v598_v36 = vpop.eup %597 }
  0x75   : > { %v600_v39 = vpop.eup %599  ;;  %v317_v42 = vmul.f32 %v598_v36, %v305_v30 }
  0x76   : > { %v318_v45 = vmul.f32 %v600_v39, %v306_v31  ;;  %v602_v49 = vpop.eup %601 }
  0x77   : > { %v319_v48 = vsub.f32 2.0, %v317_v42  ;;  %v604_v53 = vpop.eup %603  ;;  %v326_v62 = vmul.f32 0.6931472, %v602_v49 }
  0x78   : > { %v320_v52 = vsub.f32 2.0, %v318_v45  ;;  %v328_v1 = vmul.f32 0.6931472, %v604_v53 }
  0x79   : > { %v321_v56 = vmul.f32 %v598_v36, %v319_v48  ;;  %v329_v7 = vsub.f32 %v309_v63, %v326_v62 }
  0x7a   : > { %v322_v59 = vmul.f32 %v600_v39, %v320_v52  ;;  %v330_v9 = vsub.f32 %v310_v2, %v328_v1 }
  0x7b   : > { %v323_v61 = vmul.f32 %v321_v56, %v311_v51 }
  0x7c   : > { %v324_v0 = vmul.f32 %v322_v59, %v312_v55 }
  0x7d   : > { %v331_v3 = vsub.f32 1.0, %v323_v61 }
  0x7e   : > { %v332_v5 = vsub.f32 1.0, %v324_v0 }
  0x7f   : > { %v333_v8 = vmul.f32 %v331_v3, %v331_v3 }
  0x80   : > { %v334_v10 = vmul.f32 %v332_v5, %v332_v5 }
  0x81   : > { %v339_v11 = vmul.f32 %v337_v4, %v333_v8 }
  0x82   : > { %v340_v12 = vmul.f32 %v338_v6, %v334_v10 }
  0x83   : > { %v341_v13 = vmul.f32 %v339_v11, %v329_v7 }
  0x84   : > { %v342_v16 = vmul.f32 %v340_v12, %v330_v9 }
  0x86   : > { %v352_v14 = vadd.f32 %v342_v16, %v341_v13 }
  0x88   : > { %353 = vadd.xlane.f32.xlu0 %v352_v14 }
 0x115   : > { %v354_v17 = vpop.xlane.xlu0 %353 }
 0x116   : > { %v355_v18 = vrot.slane %v354_v17, 4 }
 0x118   : > { %v356_v15 = vadd.f32 %v355_v18, %v354_v17 }
 0x11a   : > { %v357_v19 = vrot.slane %v356_v15, 2 }
 0x11c   : > { %v358_v20 = vadd.f32 %v357_v19, %v356_v15 }
 0x11e   : > { %v359_v21 = vrot.slane %v358_v20, 1 }
 0x120   : > { %v360_v22 = vadd.f32 %v359_v21, %v358_v20 }
 0x122   : > { %508 = vpush %v360_v22 }
 0x153   : > { %s509_s28 = spop %508 }
 0x154   : > { %v362_v23 = vstv %s509_s28 }
 0x155   : > { %364 = vst [vmem:[%s244_s5] sm:$0xff] %v362_v23 }
 0x156   : > { %646 = shalt.err (!%p643_p13)
}
 0x157   : > { %s647_s18 = scalar_lea.hbm %s920_s30, 128  ;;  %s651_s19 = scalar_lea.hbm %s969_s2, 256 }
 0x158   : > { %p648_p0 = scmp.ne.s32.totalorder %s920_s30, %s647_s18  ;;  %p652_p1 = scmp.lt.u32.totalorder %s920_s30, %s969_s2 }
 0x159   : > { %p653_p5 = scmp.lt.u32.totalorder %s651_s19, %s647_s18  ;;  %p655_p4 = scmp.lt.u32.totalorder %s647_s18, %s920_s30 }
 0x15a   : > { %p649_p2 = pnand %p648_p0, %p976_p8 }
 0x15b   : > { %p654_p6 = por %p653_p5, %p652_p1 }
 0x15c   : > { %p650_p3 = pneg %p649_p2 }
 0x15d   : > { %p656_p9 = por %p655_p4, %p654_p6 }
 0x15f   : > { %p657_p11 = pnand %p656_p9, %p650_p3 }
 0x161   : > { %660 = shalt.err (!%p657_p11)
}
 0x162   : > { %521 = dma.vmem_to_hbm [thread:$0]  (%p976_p8), %s915_s16, 128, %s920_s30, %s366_s3  }
 0x163 PF: > { %s391_s21 = sand.u32 1, %s699_s9   ;;  %p977_p12 = scmp.ne.s32.totalorder %s975_s24, 0 }
 0x164   : > { %p978_p7 = scmp.ge.s32.totalorder %s719_s14, 2  ;;  %s392_s5 = scalar_lea.sflag [#allocation5], %s391_s21 }
 0x166   : > { %p524_p10 = pnand %p978_p7, %p977_p12 }
 0x168   : > { %694 = dma.done.wait (!%p524_p10), %s392_s5, 128  }
 0x169   : > { %696 = vsyncadd (!%p524_p10), %s392_s5, 4294967168  ;;  %s21_s14 = sadd.s32 1, %s719_s14   ;;  %s979_s9 = smov %s703_s10 }
 0x16a   : > { %p18_p13 = scmp.ge.s32.totalorder %s21_s14, 4   ;;  %s980_s10 = smov %s707_s11 }
 0x16b   : > { %s981_s11 = smov %s803_s23  ;;  %s982_s12 = smov %s715_s13 }
 0x16c   : > { %s983_s13 = smov %s985_s17  ;;  %20 = sbr.rel (!%p18_p13) target bundleno = 8 (0x8), region = 101 }
 0x173   :  { %397 = vsyncpa [#allocation4], 1 }
 0x174   :  { %399 = vsyncpa [#allocation4 + $0x1], 1 }
 0x175   :  { %400 = vsyncpa [#allocation7], 1 }
 0x176   :  { %402 = vsyncpa [#allocation7 + $0x1], 1 }
 0x177   :  { %403 = vsyncpa [#allocation5], 1 }
 0x178   :  { %405 = vsyncpa [#allocation5 + $0x1], 1 }

</bundles_post_ra>
